<compile_context>
chip_gen: v6e
topology: v6e:2x2x1
jax: 0.10.0
libtpu: 0.0.40
codegen_flags: <defaults>
</compile_context>

<pallas_src>
import jax
import jax.numpy as jnp
from jax.experimental import pallas as pl
from jax.experimental.pallas import tpu as pltpu

HIDDEN = 16      # nn.GRU(1, 16, 1)
SEQ_LEN = 3      # output.view(-1, 48) with hidden 16  =>  T == 3 (flat rows == batch rows)
FLAT_DIM = 48    # layer1 in_features
PAD = 128        # lane-dense padding for the MLP slabs / output

_VMEM_SPEC = pl.BlockSpec(memory_space=pltpu.MemorySpace.VMEM)


# ---------------------------------------------------------------------------
# Single fused kernel: GRU recurrence (unrolled, T=3) + folded layer-1 + MLP.
# ---------------------------------------------------------------------------
def _fused_kernel(x_ref, gru_ref, wmlp_ref, bmlp_ref, out_ref):
    """Operands (all whole-array VMEM blocks):
      x_ref    (B, 3)         input sequence (feature dim squeezed)
      gru_ref  (24, 48)       row 0: w_i [r|z|n]; row 1: fused b_i [b_ir+b_hr | b_iz+b_hz | b_in];
                              row 2 cols 0:16: b_hn; rows 8:24: w_h [r|z|n]
      wmlp_ref (4, 128, 128)  zero-padded W1..W4 (transposed: (in, out))
      bmlp_ref (4, 128)       zero-padded b1..b4
      out_ref  (B, 128)       cols 0:out_dim hold the result (lane-dense store)
    """
    B = x_ref.shape[0]
    H = HIDDEN
    T = SEQ_LEN

    xv = x_ref[...]                  # (B, 3)
    w_i = gru_ref[0:1, :]            # (1, 48)
    b_i = gru_ref[1:2, :]            # (1, 48)
    b_hn = gru_ref[2:3, 0:H]         # (1, 16)
    w_h = gru_ref[8:8 + H, :]        # (16, 48)

    # Hoisted input-path gate pre-activations: no dependence on h, computed for all
    # T steps up front so they sit OFF the serial recurrence chain.
    gi = [xv[:, t:t + 1] * w_i + b_i for t in range(T)]      # T x (B, 48)

    # Layer-1 folded into the recurrence (T*H == FLAT_DIM => flat rows == batch rows):
    # acc accumulates sum_t h_t @ W1[t*H:(t+1)*H, :] at the padded width of 128.
    acc = jnp.zeros((B, PAD), dtype=jnp.float32)

    h = jnp.zeros((B, H), dtype=jnp.float32)
    for t in range(T):
        g = gi[t]
        if t == 0:
            # h == 0  ->  gh == 0: skip the hidden matmul entirely.
            s = jax.nn.sigmoid(g[:, 0:2 * H])                # fused r|z sigmoid (one EUP op)
            r = s[:, 0:H]
            z = s[:, H:2 * H]
            n = jnp.tanh(g[:, 2 * H:3 * H] + r * b_hn)
            h = (1.0 - z) * n
        else:
            # TODO(synk): on v5e/v6e, if a bundle dump shows the serialized MXU
            # push->MRF-pop latency of this tiny (B,16)@(16,48) dot dominating the
            # step, switch it to a VPU broadcast-MAC formulation; keep MXU on v7x.
            gh = jnp.dot(h, w_h, preferred_element_type=jnp.float32)     # (B, 48)
            s = jax.nn.sigmoid(g[:, 0:2 * H] + gh[:, 0:2 * H])
            r = s[:, 0:H]
            z = s[:, H:2 * H]
            n = jnp.tanh(g[:, 2 * H:3 * H] + r * (gh[:, 2 * H:3 * H] + b_hn))
            h = (1.0 - z) * n + z * h
        # Layer-1 MXU pushes overlap the (VPU/EUP-bound) gate math of later steps.
        acc = acc + jnp.dot(h, wmlp_ref[0, t * H:(t + 1) * H, :],
                            preferred_element_type=jnp.float32)

    b = bmlp_ref[...]                # (4, 128)
    a = jnp.maximum(acc + b[0:1, :], 0.0)
    a = jnp.maximum(jnp.dot(a, wmlp_ref[1], preferred_element_type=jnp.float32) + b[1:2, :], 0.0)
    a = jnp.maximum(jnp.dot(a, wmlp_ref[2], preferred_element_type=jnp.float32) + b[2:3, :], 0.0)
    # Zero padding keeps cols out_dim..127 exactly 0; the wrapper slices them away.
    # Full-128-lane store => unmasked vst (lane-dense store path).
    out_ref[...] = jnp.dot(a, wmlp_ref[3], preferred_element_type=jnp.float32) + b[3:4, :]


# ---------------------------------------------------------------------------
# One-time parameter packing (gate fusion, bias pre-summing, zero padding).
# ---------------------------------------------------------------------------
def pack_params(p):
    H, F = HIDDEN, FLAT_DIM
    assert H * SEQ_LEN == F

    w_i = jnp.concatenate([p["w_ir"], p["w_iz"], p["w_in"]], axis=1)               # (1, 48)
    b_i = jnp.concatenate([p["b_ir"] + p["b_hr"],
                           p["b_iz"] + p["b_hz"],
                           p["b_in"]], axis=1)                                     # (1, 48)
    b_hn = jnp.pad(p["b_hn"], ((0, 0), (0, F - H)))                                # (1, 48)
    w_h = jnp.concatenate([p["w_hr"], p["w_hz"], p["w_hn"]], axis=1)               # (16, 48)
    vec_rows = jnp.concatenate([w_i, b_i, b_hn,
                                jnp.zeros((5, F), jnp.float32)], axis=0)           # (8, 48)
    gru_slab = jnp.concatenate([vec_rows, w_h], axis=0)                            # (24, 48)

    def pad_w(w):
        return jnp.pad(w, ((0, PAD - w.shape[0]), (0, PAD - w.shape[1])))

    def pad_b(b):
        return jnp.pad(b, ((0, 0), (0, PAD - b.shape[1])))

    wmlp = jnp.stack([pad_w(p["w1"]), pad_w(p["w2"]),
                      pad_w(p["w3"]), pad_w(p["w4"])], axis=0)                     # (4, 128, 128)
    bmlp = jnp.concatenate([pad_b(p["b1"]), pad_b(p["b2"]),
                            pad_b(p["b3"]), pad_b(p["b4"])], axis=0)               # (4, 128)
    return dict(gru=gru_slab, wmlp=wmlp, bmlp=bmlp, out_dim=p["w4"].shape[1])


# ---------------------------------------------------------------------------
# Wrapper: one gridless pallas_call, all operands whole-array VMEM blocks.
# ---------------------------------------------------------------------------
def activation_net_forward(x, packed):
    """x: (B, T=3, 1) float32, batch_first (like the PyTorch module)."""
    B, T, feat = x.shape
    assert feat == 1 and T == SEQ_LEN, "view(-1, 48) with hidden=16 implies T == 3"
    out_dim = packed["out_dim"]
    x2d = x[:, :, 0]                                   # (B, 3)

    # Gridless: total operand footprint is ~300 KiB, far under scoped VMEM limits.
    # TODO(synk): for large B, add a batch-row grid (row tile a multiple of 8) with
    # dimension_semantics=("parallel",) so v7x's two TensorCores split the work, set
    # vmem_limit_bytes against its 64 MiB budget, and emit the output packed along
    # lanes ((ceil(B/128), 128)) instead of one padded 128-lane row per batch row.
    out_pad = pl.pallas_call(
        _fused_kernel,
        out_shape=jax.ShapeDtypeStruct((B, PAD), jnp.float32),
        in_specs=[_VMEM_SPEC, _VMEM_SPEC, _VMEM_SPEC, _VMEM_SPEC],
        out_specs=_VMEM_SPEC,
    )(x2d, packed["gru"], packed["wmlp"], packed["bmlp"])
    return out_pad[:, :out_dim]                        # (B, out_dim)


# ---------------------------------------------------------------------------
# Deterministic parameter init (shapes from Activation_Net.__init__).
# ---------------------------------------------------------------------------
def init_params(key, in_dim=48, h1=32, h2=32, h3=16, out_dim=1):
    H = HIDDEN
    keys = jax.random.split(key, 20)

    def nrm(k, shape, scale=0.2):
        return (scale * jax.random.normal(k, shape)).astype(jnp.float32)

    return dict(
        # GRU weights (per-gate, stored transposed) and biases
        w_ir=nrm(keys[0], (1, H)), w_iz=nrm(keys[1], (1, H)), w_in=nrm(keys[2], (1, H)),
        w_hr=nrm(keys[3], (H, H)), w_hz=nrm(keys[4], (H, H)), w_hn=nrm(keys[5], (H, H)),
        b_ir=nrm(keys[6], (1, H)), b_iz=nrm(keys[7], (1, H)), b_in=nrm(keys[8], (1, H)),
        b_hr=nrm(keys[9], (1, H)), b_hz=nrm(keys[10], (1, H)), b_hn=nrm(keys[11], (1, H)),
        # Linear layers (transposed: (in, out))
        w1=nrm(keys[12], (in_dim, h1)), b1=nrm(keys[13], (1, h1)),
        w2=nrm(keys[14], (h1, h2)),     b2=nrm(keys[15], (1, h2)),
        w3=nrm(keys[16], (h2, h3)),     b3=nrm(keys[17], (1, h3)),
        w4=nrm(keys[18], (h3, out_dim)), b4=nrm(keys[19], (1, out_dim)),
    )


# Pure-JAX reference of the same forward pass (un-fused params) for a correctness check.
def reference_forward(x, p):
    B, T, _ = x.shape
    h = jnp.zeros((B, HIDDEN), jnp.float32)
    outs = []
    for t in range(T):
        x_t = x[:, t, :]
        r = jax.nn.sigmoid(x_t * p["w_ir"] + p["b_ir"] + h @ p["w_hr"] + p["b_hr"])
        z = jax.nn.sigmoid(x_t * p["w_iz"] + p["b_iz"] + h @ p["w_hz"] + p["b_hz"])
        n = jnp.tanh(x_t * p["w_in"] + p["b_in"] + r * (h @ p["w_hn"] + p["b_hn"]))
        h = (1.0 - z) * n + z * h
        outs.append(h)
    flat = jnp.stack(outs, axis=1).reshape(-1, FLAT_DIM)
    a = jax.nn.relu(flat @ p["w1"] + p["b1"])
    a = jax.nn.relu(a @ p["w2"] + p["b2"])
    a = jax.nn.relu(a @ p["w3"] + p["b3"])
    return a @ p["w4"] + p["b4"]


if __name__ == "__main__":
    key = jax.random.PRNGKey(0)
    k_param, k_x = jax.random.split(key)

    # Shapes consistent with the module: in_dim=48 == 3 timesteps * 16 hidden,
    # so x is (batch=2, seq=3, feature=1) and the output has B rows.
    B, T = 2, SEQ_LEN
    x = jax.random.normal(k_x, (B, T, 1), dtype=jnp.float32)
    params = init_params(k_param)
    packed = pack_params(params)

    out = activation_net_forward(x, packed)
    out = jax.block_until_ready(out)

    ref = reference_forward(x, params)
    assert out.shape == (B, 1)
    assert jnp.allclose(out, ref, atol=1e-5, rtol=1e-5), (out, ref)

    print("KERNEL_OK")
</pallas_src>

<mosaic_0001>
module attributes {stable_mosaic.version = 11 : i64} {
  func.func @_fused_kernel(%arg0: memref<2x3xf32, #tpu.memory_space<vmem>>, %arg1: memref<24x48xf32, #tpu.memory_space<vmem>>, %arg2: memref<4x128x128xf32, #tpu.memory_space<vmem>>, %arg3: memref<4x128xf32, #tpu.memory_space<vmem>>, %arg4: memref<2x128xf32, #tpu.memory_space<vmem>>) attributes {dimension_semantics = [], scalar_prefetch = 0 : i64, scratch_operands = 0 : i64, tpu.core_type = #tpu.core_type<tc>} {
    %c0 = arith.constant 0 : index
    %c0_0 = arith.constant 0 : index
    %0 = vector.load %arg0[%c0, %c0_0] : memref<2x3xf32, #tpu.memory_space<vmem>>, vector<2x3xf32>
    %c0_1 = arith.constant 0 : index
    %c0_2 = arith.constant 0 : index
    %1 = vector.load %arg1[%c0_1, %c0_2] : memref<24x48xf32, #tpu.memory_space<vmem>>, vector<1x48xf32>
    %c1 = arith.constant 1 : index
    %c0_3 = arith.constant 0 : index
    %2 = vector.load %arg1[%c1, %c0_3] : memref<24x48xf32, #tpu.memory_space<vmem>>, vector<1x48xf32>
    %c2 = arith.constant 2 : index
    %c0_4 = arith.constant 0 : index
    %3 = vector.load %arg1[%c2, %c0_4] : memref<24x48xf32, #tpu.memory_space<vmem>>, vector<1x16xf32>
    %c8 = arith.constant 8 : index
    %c0_5 = arith.constant 0 : index
    %4 = vector.load %arg1[%c8, %c0_5] : memref<24x48xf32, #tpu.memory_space<vmem>>, vector<16x48xf32>
    %5 = vector.extract_strided_slice %0 {offsets = [0, 0], sizes = [2, 1], strides = [1, 1]} : vector<2x3xf32> to vector<2x1xf32>
    %6 = vector.broadcast %5 : vector<2x1xf32> to vector<2x48xf32>
    %7 = vector.broadcast %1 : vector<1x48xf32> to vector<2x48xf32>
    %8 = arith.mulf %6, %7 : vector<2x48xf32>
    %9 = vector.broadcast %2 : vector<1x48xf32> to vector<2x48xf32>
    %10 = arith.addf %8, %9 : vector<2x48xf32>
    %11 = vector.extract_strided_slice %0 {offsets = [0, 1], sizes = [2, 1], strides = [1, 1]} : vector<2x3xf32> to vector<2x1xf32>
    %12 = vector.broadcast %11 : vector<2x1xf32> to vector<2x48xf32>
    %13 = vector.broadcast %1 : vector<1x48xf32> to vector<2x48xf32>
    %14 = arith.mulf %12, %13 : vector<2x48xf32>
    %15 = vector.broadcast %2 : vector<1x48xf32> to vector<2x48xf32>
    %16 = arith.addf %14, %15 : vector<2x48xf32>
    %17 = vector.extract_strided_slice %0 {offsets = [0, 2], sizes = [2, 1], strides = [1, 1]} : vector<2x3xf32> to vector<2x1xf32>
    %18 = vector.broadcast %17 : vector<2x1xf32> to vector<2x48xf32>
    %19 = vector.broadcast %1 : vector<1x48xf32> to vector<2x48xf32>
    %20 = arith.mulf %18, %19 : vector<2x48xf32>
    %21 = vector.broadcast %2 : vector<1x48xf32> to vector<2x48xf32>
    %22 = arith.addf %20, %21 : vector<2x48xf32>
    %cst = arith.constant 0.000000e+00 : f32
    %23 = vector.broadcast %cst : f32 to vector<2x128xf32>
    %24 = vector.extract_strided_slice %10 {offsets = [0, 0], sizes = [2, 32], strides = [1, 1]} : vector<2x48xf32> to vector<2x32xf32>
    %25 = arith.negf %24 : vector<2x32xf32>
    %26 = math.exp %25 : vector<2x32xf32>
    %cst_6 = arith.constant 1.000000e+00 : f32
    %27 = vector.broadcast %cst_6 : f32 to vector<2x32xf32>
    %28 = arith.addf %27, %26 : vector<2x32xf32>
    %29 = arith.divf %27, %28 : vector<2x32xf32>
    %30 = vector.extract_strided_slice %29 {offsets = [0, 0], sizes = [2, 16], strides = [1, 1]} : vector<2x32xf32> to vector<2x16xf32>
    %31 = vector.extract_strided_slice %29 {offsets = [0, 16], sizes = [2, 16], strides = [1, 1]} : vector<2x32xf32> to vector<2x16xf32>
    %32 = vector.extract_strided_slice %10 {offsets = [0, 32], sizes = [2, 16], strides = [1, 1]} : vector<2x48xf32> to vector<2x16xf32>
    %33 = vector.broadcast %3 : vector<1x16xf32> to vector<2x16xf32>
    %34 = arith.mulf %30, %33 : vector<2x16xf32>
    %35 = arith.addf %32, %34 : vector<2x16xf32>
    %36 = math.tanh %35 : vector<2x16xf32>
    %cst_7 = arith.constant 1.000000e+00 : f32
    %37 = vector.broadcast %cst_7 : f32 to vector<2x16xf32>
    %38 = arith.subf %37, %31 : vector<2x16xf32>
    %39 = arith.mulf %38, %36 : vector<2x16xf32>
    %c0_8 = arith.constant 0 : index
    %c0_9 = arith.constant 0 : index
    %c0_10 = arith.constant 0 : index
    %40 = vector.load %arg2[%c0_8, %c0_9, %c0_10] : memref<4x128x128xf32, #tpu.memory_space<vmem>>, vector<1x16x128xf32>
    %41 = vector.shape_cast %40 : vector<1x16x128xf32> to vector<16x128xf32>
    %cst_11 = arith.constant dense<0.000000e+00> : vector<2x128xf32>
    %42 = tpu.matmul %39, %41, %cst_11 {dimension_numbers = #tpu.dot_dimension_numbers<[1], [0], [0], [1], [0, 0, 1, 1], [], []>} : vector<2x16xf32>, vector<16x128xf32>, vector<2x128xf32> -> vector<2x128xf32>
    %43 = arith.addf %23, %42 : vector<2x128xf32>
    %cst_12 = arith.constant dense<0.000000e+00> : vector<2x48xf32>
    %44 = tpu.matmul %39, %4, %cst_12 {dimension_numbers = #tpu.dot_dimension_numbers<[1], [0], [0], [1], [0, 0, 1, 1], [], []>} : vector<2x16xf32>, vector<16x48xf32>, vector<2x48xf32> -> vector<2x48xf32>
    %45 = vector.extract_strided_slice %16 {offsets = [0, 0], sizes = [2, 32], strides = [1, 1]} : vector<2x48xf32> to vector<2x32xf32>
    %46 = vector.extract_strided_slice %44 {offsets = [0, 0], sizes = [2, 32], strides = [1, 1]} : vector<2x48xf32> to vector<2x32xf32>
    %47 = arith.addf %45, %46 : vector<2x32xf32>
    %48 = arith.negf %47 : vector<2x32xf32>
    %49 = math.exp %48 : vector<2x32xf32>
    %cst_13 = arith.constant 1.000000e+00 : f32
    %50 = vector.broadcast %cst_13 : f32 to vector<2x32xf32>
    %51 = arith.addf %50, %49 : vector<2x32xf32>
    %52 = arith.divf %50, %51 : vector<2x32xf32>
    %53 = vector.extract_strided_slice %52 {offsets = [0, 0], sizes = [2, 16], strides = [1, 1]} : vector<2x32xf32> to vector<2x16xf32>
    %54 = vector.extract_strided_slice %52 {offsets = [0, 16], sizes = [2, 16], strides = [1, 1]} : vector<2x32xf32> to vector<2x16xf32>
    %55 = vector.extract_strided_slice %16 {offsets = [0, 32], sizes = [2, 16], strides = [1, 1]} : vector<2x48xf32> to vector<2x16xf32>
    %56 = vector.extract_strided_slice %44 {offsets = [0, 32], sizes = [2, 16], strides = [1, 1]} : vector<2x48xf32> to vector<2x16xf32>
    %57 = vector.broadcast %3 : vector<1x16xf32> to vector<2x16xf32>
    %58 = arith.addf %56, %57 : vector<2x16xf32>
    %59 = arith.mulf %53, %58 : vector<2x16xf32>
    %60 = arith.addf %55, %59 : vector<2x16xf32>
    %61 = math.tanh %60 : vector<2x16xf32>
    %cst_14 = arith.constant 1.000000e+00 : f32
    %62 = vector.broadcast %cst_14 : f32 to vector<2x16xf32>
    %63 = arith.subf %62, %54 : vector<2x16xf32>
    %64 = arith.mulf %63, %61 : vector<2x16xf32>
    %65 = arith.mulf %54, %39 : vector<2x16xf32>
    %66 = arith.addf %64, %65 : vector<2x16xf32>
    %c0_15 = arith.constant 0 : index
    %c16 = arith.constant 16 : index
    %c0_16 = arith.constant 0 : index
    %67 = vector.load %arg2[%c0_15, %c16, %c0_16] : memref<4x128x128xf32, #tpu.memory_space<vmem>>, vector<1x16x128xf32>
    %68 = vector.shape_cast %67 : vector<1x16x128xf32> to vector<16x128xf32>
    %cst_17 = arith.constant dense<0.000000e+00> : vector<2x128xf32>
    %69 = tpu.matmul %66, %68, %cst_17 {dimension_numbers = #tpu.dot_dimension_numbers<[1], [0], [0], [1], [0, 0, 1, 1], [], []>} : vector<2x16xf32>, vector<16x128xf32>, vector<2x128xf32> -> vector<2x128xf32>
    %70 = arith.addf %43, %69 : vector<2x128xf32>
    %cst_18 = arith.constant dense<0.000000e+00> : vector<2x48xf32>
    %71 = tpu.matmul %66, %4, %cst_18 {dimension_numbers = #tpu.dot_dimension_numbers<[1], [0], [0], [1], [0, 0, 1, 1], [], []>} : vector<2x16xf32>, vector<16x48xf32>, vector<2x48xf32> -> vector<2x48xf32>
    %72 = vector.extract_strided_slice %22 {offsets = [0, 0], sizes = [2, 32], strides = [1, 1]} : vector<2x48xf32> to vector<2x32xf32>
    %73 = vector.extract_strided_slice %71 {offsets = [0, 0], sizes = [2, 32], strides = [1, 1]} : vector<2x48xf32> to vector<2x32xf32>
    %74 = arith.addf %72, %73 : vector<2x32xf32>
    %75 = arith.negf %74 : vector<2x32xf32>
    %76 = math.exp %75 : vector<2x32xf32>
    %cst_19 = arith.constant 1.000000e+00 : f32
    %77 = vector.broadcast %cst_19 : f32 to vector<2x32xf32>
    %78 = arith.addf %77, %76 : vector<2x32xf32>
    %79 = arith.divf %77, %78 : vector<2x32xf32>
    %80 = vector.extract_strided_slice %79 {offsets = [0, 0], sizes = [2, 16], strides = [1, 1]} : vector<2x32xf32> to vector<2x16xf32>
    %81 = vector.extract_strided_slice %79 {offsets = [0, 16], sizes = [2, 16], strides = [1, 1]} : vector<2x32xf32> to vector<2x16xf32>
    %82 = vector.extract_strided_slice %22 {offsets = [0, 32], sizes = [2, 16], strides = [1, 1]} : vector<2x48xf32> to vector<2x16xf32>
    %83 = vector.extract_strided_slice %71 {offsets = [0, 32], sizes = [2, 16], strides = [1, 1]} : vector<2x48xf32> to vector<2x16xf32>
    %84 = vector.broadcast %3 : vector<1x16xf32> to vector<2x16xf32>
    %85 = arith.addf %83, %84 : vector<2x16xf32>
    %86 = arith.mulf %80, %85 : vector<2x16xf32>
    %87 = arith.addf %82, %86 : vector<2x16xf32>
    %88 = math.tanh %87 : vector<2x16xf32>
    %cst_20 = arith.constant 1.000000e+00 : f32
    %89 = vector.broadcast %cst_20 : f32 to vector<2x16xf32>
    %90 = arith.subf %89, %81 : vector<2x16xf32>
    %91 = arith.mulf %90, %88 : vector<2x16xf32>
    %92 = arith.mulf %81, %66 : vector<2x16xf32>
    %93 = arith.addf %91, %92 : vector<2x16xf32>
    %c0_21 = arith.constant 0 : index
    %c32 = arith.constant 32 : index
    %c0_22 = arith.constant 0 : index
    %94 = vector.load %arg2[%c0_21, %c32, %c0_22] : memref<4x128x128xf32, #tpu.memory_space<vmem>>, vector<1x16x128xf32>
    %95 = vector.shape_cast %94 : vector<1x16x128xf32> to vector<16x128xf32>
    %cst_23 = arith.constant dense<0.000000e+00> : vector<2x128xf32>
    %96 = tpu.matmul %93, %95, %cst_23 {dimension_numbers = #tpu.dot_dimension_numbers<[1], [0], [0], [1], [0, 0, 1, 1], [], []>} : vector<2x16xf32>, vector<16x128xf32>, vector<2x128xf32> -> vector<2x128xf32>
    %97 = arith.addf %70, %96 : vector<2x128xf32>
    %c0_24 = arith.constant 0 : index
    %c0_25 = arith.constant 0 : index
    %98 = vector.load %arg3[%c0_24, %c0_25] : memref<4x128xf32, #tpu.memory_space<vmem>>, vector<4x128xf32>
    %99 = vector.extract_strided_slice %98 {offsets = [0, 0], sizes = [1, 128], strides = [1, 1]} : vector<4x128xf32> to vector<1x128xf32>
    %100 = vector.broadcast %99 : vector<1x128xf32> to vector<2x128xf32>
    %101 = arith.addf %97, %100 : vector<2x128xf32>
    %cst_26 = arith.constant 0.000000e+00 : f32
    %102 = vector.broadcast %cst_26 : f32 to vector<2x128xf32>
    %103 = arith.maximumf %101, %102 : vector<2x128xf32>
    %c1_27 = arith.constant 1 : index
    %c0_28 = arith.constant 0 : index
    %c0_29 = arith.constant 0 : index
    %104 = vector.load %arg2[%c1_27, %c0_28, %c0_29] : memref<4x128x128xf32, #tpu.memory_space<vmem>>, vector<1x128x128xf32>
    %105 = vector.shape_cast %104 : vector<1x128x128xf32> to vector<128x128xf32>
    %cst_30 = arith.constant dense<0.000000e+00> : vector<2x128xf32>
    %106 = tpu.matmul %103, %105, %cst_30 {dimension_numbers = #tpu.dot_dimension_numbers<[1], [0], [0], [1], [0, 0, 1, 1], [], []>} : vector<2x128xf32>, vector<128x128xf32>, vector<2x128xf32> -> vector<2x128xf32>
    %107 = vector.extract_strided_slice %98 {offsets = [1, 0], sizes = [1, 128], strides = [1, 1]} : vector<4x128xf32> to vector<1x128xf32>
    %108 = vector.broadcast %107 : vector<1x128xf32> to vector<2x128xf32>
    %109 = arith.addf %106, %108 : vector<2x128xf32>
    %cst_31 = arith.constant 0.000000e+00 : f32
    %110 = vector.broadcast %cst_31 : f32 to vector<2x128xf32>
    %111 = arith.maximumf %109, %110 : vector<2x128xf32>
    %c2_32 = arith.constant 2 : index
    %c0_33 = arith.constant 0 : index
    %c0_34 = arith.constant 0 : index
    %112 = vector.load %arg2[%c2_32, %c0_33, %c0_34] : memref<4x128x128xf32, #tpu.memory_space<vmem>>, vector<1x128x128xf32>
    %113 = vector.shape_cast %112 : vector<1x128x128xf32> to vector<128x128xf32>
    %cst_35 = arith.constant dense<0.000000e+00> : vector<2x128xf32>
    %114 = tpu.matmul %111, %113, %cst_35 {dimension_numbers = #tpu.dot_dimension_numbers<[1], [0], [0], [1], [0, 0, 1, 1], [], []>} : vector<2x128xf32>, vector<128x128xf32>, vector<2x128xf32> -> vector<2x128xf32>
    %115 = vector.extract_strided_slice %98 {offsets = [2, 0], sizes = [1, 128], strides = [1, 1]} : vector<4x128xf32> to vector<1x128xf32>
    %116 = vector.broadcast %115 : vector<1x128xf32> to vector<2x128xf32>
    %117 = arith.addf %114, %116 : vector<2x128xf32>
    %cst_36 = arith.constant 0.000000e+00 : f32
    %118 = vector.broadcast %cst_36 : f32 to vector<2x128xf32>
    %119 = arith.maximumf %117, %118 : vector<2x128xf32>
    %c3 = arith.constant 3 : index
    %c0_37 = arith.constant 0 : index
    %c0_38 = arith.constant 0 : index
    %120 = vector.load %arg2[%c3, %c0_37, %c0_38] : memref<4x128x128xf32, #tpu.memory_space<vmem>>, vector<1x128x128xf32>
    %121 = vector.shape_cast %120 : vector<1x128x128xf32> to vector<128x128xf32>
    %cst_39 = arith.constant dense<0.000000e+00> : vector<2x128xf32>
    %122 = tpu.matmul %119, %121, %cst_39 {dimension_numbers = #tpu.dot_dimension_numbers<[1], [0], [0], [1], [0, 0, 1, 1], [], []>} : vector<2x128xf32>, vector<128x128xf32>, vector<2x128xf32> -> vector<2x128xf32>
    %123 = vector.extract_strided_slice %98 {offsets = [3, 0], sizes = [1, 128], strides = [1, 1]} : vector<4x128xf32> to vector<1x128xf32>
    %124 = vector.broadcast %123 : vector<1x128xf32> to vector<2x128xf32>
    %125 = arith.addf %122, %124 : vector<2x128xf32>
    %c0_40 = arith.constant 0 : index
    %c0_41 = arith.constant 0 : index
    %126 = vector.load %arg4[%c0_40, %c0_41] : memref<2x128xf32, #tpu.memory_space<vmem>>, vector<2x128xf32>
    tpu.vector_store %arg4[%c0_40, %c0_41], %125 {strides = array<i32>} : memref<2x128xf32, #tpu.memory_space<vmem>>, vector<2x128xf32>,
    return
  }
}

</mosaic_0001>

<bundles_post_ra>
// kernel: tpu_custom_call.1
= control target key start
LH: loop header
LB: loop body
LE: loop exit
PB: predicated region body
PF: predicated region fallthrough
CT: control target
= control target key end

     0   :  { %9 = vsyncpa [#allocation3], 0  ;;  %s1368_s0 = inlined_call_operand.hbm [shape: f32[2,3], index: 0, kind: input, shape index: {}]   ;;  %s1369_s1 = inlined_call_operand.hbm [shape: f32[24,48], index: 1, kind: input, shape index: {}]   ;;  %s1370_s2 = inlined_call_operand.hbm [shape: f32[4,128,128], index: 2, kind: input, shape index: {}]   ;;  %s1371_s3 = inlined_call_operand.vmem [shape: f32[4,128], index: 3, kind: input, shape index: {}]   ;;  %s1372_s4 = inlined_call_operand.hbm [shape: f32[2,128], index: 4, kind: output, shape index: {}]  }
   0x1   :  { %10 = vsyncpa [#allocation6], 0 }
   0x2   :  { %11 = vsyncpa [#allocation4], 0  ;;  %s1181_s15 = smov [#allocation5]  }
   0x3   :  { %s27_s16 = sshll.u32 %s1181_s15, 4  ;;  %s28_s16 = int_to_ptr.vmem [resolvable:$true] %s27_s16 }
   0x4   :  { %s1103_s17 = scalar_lea.vmem %s28_s16, 384  ;;  %p1108_p1 = scmp.lt.s32.totalorder %s28_s16, %s28_s16 }
   0x5   :  { %p1104_p0 = scmp.ne.s32.totalorder %s28_s16, %s1103_s17  ;;  %p1109_p2 = scmp.lt.s32.totalorder %s1103_s17, %s1103_s17 }
   0x7   :  { %p1110_p3 = por %p1109_p2, %p1108_p1 }
   0x9   :  { %p1111_p4 = pnand %p1110_p3, %p1104_p0 }
   0xb   :  { %1114 = shalt.err (!%p1111_p4)
}
   0xc   :  { %s1182_s18 = smov 128   ;;  %s1183_s19 = smov 8  }
   0xd   :  { %33 = dma.hbm_to_vmem [thread:$0]  %s1369_s1, 384, %s28_s16, [#allocation6], %s1182_s18, %s1182_s18, %s1183_s19  }
   0xe   :  { %s1184_s22 = smov [#allocation2]   ;;  %s1185_s24 = smov [#allocation7]  }
   0xf   :  { %s18_s23 = sshll.u32 %s1184_s22, 4  ;;  %s39_s25 = sshll.u32 %s1185_s24, 4  ;;  %s19_s23 = int_to_ptr.vmem [resolvable:$true] %s18_s23  ;;  %s40_s25 = int_to_ptr.vmem [resolvable:$true] %s39_s25 }
  0x10   :  { %s1123_s26 = scalar_lea.vmem %s19_s23, 32  ;;  %p1128_p6 = scmp.lt.s32.totalorder %s19_s23, %s19_s23 }
  0x11   :  { %p1124_p5 = scmp.ne.s32.totalorder %s19_s23, %s1123_s26  ;;  %p1129_p7 = scmp.lt.s32.totalorder %s1123_s26, %s1123_s26 }
  0x13   :  { %p1130_p8 = por %p1129_p7, %p1128_p6 }
  0x15   :  { %p1131_p9 = pnand %p1130_p8, %p1124_p5 }
  0x17   :  { %1134 = shalt.err (!%p1131_p9)
}
  0x18   :  { %21 = dma.hbm_to_vmem [thread:$0]  %s1368_s0, 32, %s19_s23, [#allocation3]  }
  0x19   :  { %s1143_s29 = scalar_lea.vmem %s40_s25, 8192  ;;  %p1148_p11 = scmp.lt.s32.totalorder %s40_s25, %s40_s25 }
  0x1a   :  { %p1144_p10 = scmp.ne.s32.totalorder %s40_s25, %s1143_s29  ;;  %p1149_p12 = scmp.lt.s32.totalorder %s1143_s29, %s1143_s29 }
  0x1c   :  { %p1150_p13 = por %p1149_p12, %p1148_p11 }
  0x1e   :  { %p1151_p0 = pnand %p1150_p13, %p1144_p10 }
  0x20   :  { %1154 = shalt.err (!%p1151_p0)
}
  0x21   :  { %45 = dma.hbm_to_vmem [thread:$0]  %s1370_s2, 8192, %s40_s25, [#allocation6], %s1182_s18, %s1182_s18, %s1183_s19  }
  0x22   :  { %1175 = dma.done.wait [#allocation3], 32  }
  0x23   :  { %1176 = vsyncadd [#allocation3], 4294967264 }
  0x24   :  { %1177 = dma.done.wait [#allocation6], 8576  }
  0x25   :  { %1178 = vsyncadd [#allocation6], 4294958720  ;;  %v1186_v0 = vmov 0   ;;  %v1229_v1 = vld [vmem:[#allocation2] sm:$0x3]  ;;  %s1187_s0 = smov 32  }
  0x26   :  { %1074 = vset.pattern.permute.xlu0 %v1186_v0  ;;  %v1232_v2 = vld [vmem:[#allocation5] ss:$0 sm:$0xff]  ;;  %v1234_v3 = vld [vmem:[#allocation5 + $0x1] ss:$0 sm:$0xff]  ;;  %v846_v10 = vld [vmem:[#allocation5 + $0x2] ss:$0 sm:$0xff] }
  0x27   :  { %65 = vperm.xlu0 %1074, %v1229_v1   ;;  %v1240_v15 = vld [vmem:[#allocation5 + $0x10] sm:$0xff]  ;;  %v1188_v16 = vmov 0.0   ;;  %v1243_v17 = vld [vmem:[#allocation5 + $0x8] sm:$0xff]  ;;  %vm1189_vm0 = vmmov 0   ;;  %s1190_s2 = smov 112   ;;  %v1191_v19 = vmov 1  }
  0x28   :  { %920 = vmatprep.subr.mxu0 %v1188_v16  ;;  %924 = vmatprep.mubr.msk.f32.mxu0 %vm1189_vm0, %v1188_v16  ;;  %vm118_vm1 = vcmask 130048   ;;  %s1192_s5 = smov 96   ;;  %v223_v40 = vld [vmem:[#allocation7 + $0x18] sm:$0xff]  ;;  %v222_v41 = vld [vmem:[#allocation7 + $0x10] sm:$0xff]  ;;  %v1193_v47 = vmov 2   ;;  %v114_v49 = vld [vmem:[#allocation7 + $0x8] sm:$0xff] }
  0x29   :  { %921 = vmatpush3.msra.mxu0 %v1240_v15  ;;  %955 = vmatprep.subr.mxu1 %v1188_v16  ;;  %v113_v51 = vld [vmem:[#allocation7] sm:$0xff] }
  0x2a   :  { %922 = vmatprep.subr.mxu0 %v1188_v16  ;;  %987 = vmatprep.mubr.msk.f32.mxu1 %vm1189_vm0, %v1188_v16 }
  0x2b   :  { %923 = vmatpush3.msra.mxu0 %v1243_v17  ;;  %1075 = vset.pattern.permute.xlu1 %v1191_v19  ;;  %v562_v19 = vld [vmem:[#allocation7 + $0xd0] sm:$0xff] }
  0x2c   :  { %927 = vmatprep.subr.mxu0 %v1188_v16  ;;  %1076 = vset.pattern.permute.xlu0 %v1193_v47  ;;  %v545_v47 = vlaneseq }
  0xa2   :  { %v66_v4 = vpop.permute.xlu0 %65 }
  0xa3   :  { %v72_v5 = vmul.f32 %v1232_v2, %v66_v4 }
  0xa5   :  { %v77_v6 = vadd.f32 %v1234_v3, %v72_v5 }
  0xa7   :  { %v845_v7 = vmul.f32 -1.442695, %v77_v6 }
  0xa9   :  { %1077 = vpow2.f32 %v845_v7 }
  0xb6   :  { %v1078_v8 = vpop.eup %1077 }
  0xb7   :  { %v93_v9 = vadd.f32 1.0, %v1078_v8 }
  0xb9   :  { %1079 = vrcp.f32 %v93_v9 }
  0xc6   :  { %v1080_v11 = vpop.eup %1079 }
  0xc7   :  { %v100_v12 = vmul.f32 %v1080_v11, %v846_v10  ;;  %v107_v20 = vsub.f32 1.0, %v1080_v11  ;;  %v466_v11 = vld [vmem:[#allocation7 + $0x20] sm:$0xff] }
  0xc9   :  { %102 = vrot.lane.b32.xlu0 %v100_v12, %s1187_s0  ;;  %v566_v12 = vld [vmem:[#allocation7 + $0xf0] sm:$0xff] }
  0xcd   :  { %199 = vrot.lane.b32.xlu0 %v846_v10, %s1187_s0  ;;  %v467_v10 = vld [vmem:[#allocation7 + $0x28] sm:$0xff] }
 0x13b   :  { %v103_v13 = vpop.permute.xlu0 %102 }
 0x13c   :  { %v105_v14 = vadd.f32 %v103_v13, %v77_v6  ;;  %v565_v13 = vld [vmem:[#allocation7 + $0xe8] sm:$0xff] }
 0x13e   :  { %1081 = vtanh.f32 %v105_v14  ;;  %v564_v14 = vld [vmem:[#allocation7 + $0xe0] sm:$0xff] }
 0x13f   :  { %v200_v24 = vpop.permute.xlu0 %199 }
 0x14b   :  { %v1082_v18 = vpop.eup %1081 }
 0x14c   :  { %109 = vrot.lane.b32.xlu1 %v1082_v18, %s1190_s2 }
 0x1be   :  { %v110_v21 = vpop.permute.xlu1 %109 }
 0x1bf   :  { %v112_v22 = vmul.f32 %v110_v21, %v107_v20 }
 0x1c1   :  { %116 = vrot.lane.b32.xlu1 %v112_v22, %s1190_s2 }
 0x1c5   :  { %79 = vperm.xlu1 %1075, %v1229_v1  }
 0x233   :  { %v117_v23 = vpop.permute.xlu1 %116 }
 0x234   :  { %925 = vmatmul.mubr.msk.f32.vlgmr.msra.gmra.mxu0 %vm118_vm1, %v117_v23 }
 0x235   :  { %931 = vmatprep.mubr.msk.f32.mxu0 %vm1189_vm0, %v1188_v16  ;;  %928 = vmatpush3.msra.mxu0 %v223_v40  ;;  %v653_v40 = vld [vmem:[#allocation7 + $0x148] sm:$0xff] }
 0x236   :  { %929 = vmatprep.subr.mxu0 %v1188_v16 }
 0x237   :  { %930 = vmatpush3.msra.mxu0 %v222_v41  ;;  %v652_v41 = vld [vmem:[#allocation7 + $0x140] sm:$0xff] }
 0x238   :  { %934 = vmatprep.subr.mxu0 %v1188_v16 }
 0x240   :  { %v80_v28 = vpop.permute.xlu1 %79 }
 0x241   :  { %v82_v29 = vmul.f32 %v1232_v2, %v80_v28  ;;  %v556_v28 = vld [vmem:[#allocation7 + $0xa0] sm:$0xff] }
 0x243   :  { %v83_v30 = vadd.f32 %v1234_v3, %v82_v29 }
 0x2f4   :  { %v187_v25 = vpop.f32.mrf.mxu0 }
 0x2f5   :  { %v202_v26 = vadd.f32 %v200_v24, %v187_v25  ;;  %v191_v31 = vadd.f32 %v187_v25, %v83_v30  ;;  %v559_v25 = vld [vmem:[#allocation7 + $0xb8] sm:$0xff] }
 0x2f6   :  { %v926_v27 = vpop.f32.mrf.mxu0 }
 0x2f7   :  { %204 = vrot.lane.b32.xlu0 %v202_v26, %s1192_s5  ;;  %v848_v32 = vmul.f32 -1.442695, %v191_v31  ;;  %v558_v26 = vld [vmem:[#allocation7 + $0xb0] sm:$0xff]  ;;  %v557_v27 = vld [vmem:[#allocation7 + $0xa8] sm:$0xff] }
 0x2f8   :  { %v554_v31 = vld [vmem:[#allocation7 + $0x90] sm:$0xff] }
 0x2f9   :  { %1083 = vpow2.f32 %v848_v32  ;;  %v553_v32 = vld [vmem:[#allocation7 + $0x88] sm:$0xff] }
 0x306   :  { %v1084_v33 = vpop.eup %1083 }
 0x307   :  { %v195_v34 = vadd.f32 1.0, %v1084_v33  ;;  %v552_v33 = vld [vmem:[#allocation7 + $0x80] sm:$0xff] }
 0x309   :  { %1085 = vrcp.f32 %v195_v34  ;;  %v659_v34 = vld [vmem:[#allocation7 + $0x178] sm:$0xff] }
 0x316   :  { %v1086_v35 = vpop.eup %1085 }
 0x317   :  { %v214_v43 = vsub.f32 1.0, %v1086_v35  ;;  %v220_v45 = vmul.f32 %v1086_v35, %v112_v22  ;;  %v561_v22 = vld [vmem:[#allocation7 + $0xc8] sm:$0xff] }
 0x369   :  { %v205_v36 = vpop.permute.xlu0 %204 }
 0x36a   :  { %v207_v37 = vmul.f32 %v1086_v35, %v205_v36  ;;  %v658_v35 = vld [vmem:[#allocation7 + $0x170] sm:$0xff]  ;;  %v657_v36 = vld [vmem:[#allocation7 + $0x168] sm:$0xff] }
 0x36c   :  { %209 = vrot.lane.b32.xlu1 %v207_v37, %s1187_s0  ;;  %v656_v37 = vld [vmem:[#allocation7 + $0x160] sm:$0xff] }
 0x3de   :  { %v210_v38 = vpop.permute.xlu1 %209 }
 0x3df   :  { %v212_v39 = vadd.f32 %v210_v38, %v83_v30  ;;  %v555_v30 = vld [vmem:[#allocation7 + $0x98] sm:$0xff] }
 0x3e0   :  { %v655_v38 = vld [vmem:[#allocation7 + $0x158] sm:$0xff] }
 0x3e1   :  { %1087 = vtanh.f32 %v212_v39  ;;  %v654_v39 = vld [vmem:[#allocation7 + $0x150] sm:$0xff] }
 0x3ee   :  { %v1088_v42 = vpop.eup %1087 }
 0x3ef   :  { %216 = vrot.lane.b32.xlu0 %v1088_v42, %s1190_s2  ;;  %v651_v42 = vld [vmem:[#allocation7 + $0x138] sm:$0xff] }
 0x3f3   :  { %85 = vperm.xlu0 %1076, %v1229_v1  }
 0x461   :  { %v217_v44 = vpop.permute.xlu0 %216 }
 0x462   :  { %v219_v46 = vmul.f32 %v217_v44, %v214_v43  ;;  %v650_v43 = vld [vmem:[#allocation7 + $0x130] sm:$0xff]  ;;  %v649_v44 = vld [vmem:[#allocation7 + $0x128] sm:$0xff] }
 0x464   :  { %v1268_v48 = vadd.f32 %v220_v45, %v219_v46  ;;  %v648_v45 = vld [vmem:[#allocation7 + $0x120] sm:$0xff]  ;;  %v647_v46 = vld [vmem:[#allocation7 + $0x118] sm:$0xff] }
 0x466   :  { %225 = vrot.lane.b32.xlu1 %v1268_v48, %s1190_s2 }
 0x46e   :  { %v86_v60 = vpop.permute.xlu0 %85 }
 0x46f   :  { %v88_v61 = vmul.f32 %v1232_v2, %v86_v60  ;;  %v644_v60 = vld [vmem:[#allocation7 + $0x100] sm:$0xff] }
 0x471   :  { %v89_v62 = vadd.f32 %v1234_v3, %v88_v61  ;;  %v567_v3 = vld [vmem:[#allocation7 + $0xf8] sm:$0xff] }
 0x472   :  { %956 = vmatpush3.msra.mxu1 %v567_v3  ;;  %v751_v61 = vld [vmem:[#allocation7 + $0x1f8] sm:$0xff] }
 0x473   :  { %957 = vmatprep.subr.mxu1 %v1188_v16 }
 0x474   :  { %958 = vmatpush3.msra.mxu1 %v566_v12 }
 0x475   :  { %959 = vmatprep.subr.mxu1 %v1188_v16 }
 0x476   :  { %960 = vmatpush3.msra.mxu1 %v565_v13 }
 0x477   :  { %961 = vmatprep.subr.mxu1 %v1188_v16 }
 0x478   :  { %962 = vmatpush3.msra.mxu1 %v564_v14 }
 0x479   :  { %963 = vmatprep.subr.mxu1 %v1188_v16 }
 0x4d8   :  { %v226_v50 = vpop.permute.xlu1 %225 }
 0x4d9   :  { %932 = vmatmul.mubr.msk.f32.vlgmr.msra.gmra.mxu0 %vm118_vm1, %v226_v50 }
 0x4da   :  { %935 = vmatpush3.msra.mxu0 %v114_v49  ;;  %938 = vmatprep.mubr.msk.f32.mxu0 %vm1189_vm0, %v1188_v16 }
 0x4db   :  { %936 = vmatprep.subr.mxu0 %v1188_v16 }
 0x4dc   :  { %937 = vmatpush3.msra.mxu0 %v113_v51 }
 0x4dd   :  { %941 = vmatprep.subr.mxu0 %v1188_v16  ;;  %939 = vmatmul.mubr.msk.f32.vlgmr.msra.gmra.mxu0 %vm118_vm1, %v117_v23 }
 0x4de   :  { %942 = vmatpush3.msra.mxu0 %v1240_v15  ;;  %945 = vmatprep.mubr.msk.f32.mxu0 %vm1189_vm0, %v1188_v16  ;;  %v563_v15 = vld [vmem:[#allocation7 + $0xd8] sm:$0xff] }
 0x4df   :  { %943 = vmatprep.subr.mxu0 %v1188_v16  ;;  %964 = vmatpush3.msra.mxu1 %v563_v15  ;;  %v738_v15 = vld [vmem:[#allocation7 + $0x190] sm:$0xff] }
 0x4e0   :  { %944 = vmatpush3.msra.mxu0 %v1243_v17  ;;  %965 = vmatprep.subr.mxu1 %v1188_v16 }
 0x4e1   :  { %946 = vmatmul.mubr.msk.f32.vlgmr.msra.gmra.mxu0 %vm118_vm1, %v226_v50  ;;  %948 = vmatprep.subr.mxu0 %v1188_v16  ;;  %v1336_v50 = vld [vmem:[%s1371_s3] sm:$0xf]  ;;  %s1194_s3 = smov [#allocation8]  }
 0x4e2   :  { %952 = vmatprep.mubr.msk.f32.mxu0 %vm1189_vm0, %v1188_v16  ;;  %949 = vmatpush3.msra.mxu0 %v467_v10  ;;  %v739_v10 = vld [vmem:[#allocation7 + $0x198] sm:$0xff]  ;;  %s833_s8 = sshll.u32 %s1194_s3, 4  ;;  %s834_s8 = int_to_ptr.vmem [resolvable:$true] %s833_s8 }
 0x4e3   :  { %950 = vmatprep.subr.mxu0 %v1188_v16  ;;  %966 = vmatpush3.msra.mxu1 %v562_v19  ;;  %s1155_s9 = scalar_lea.vmem %s834_s8, 32  ;;  %p1160_p2 = scmp.lt.s32.totalorder %s834_s8, %s834_s8 }
 0x4e4   :  { %951 = vmatpush3.msra.mxu0 %v466_v11  ;;  %967 = vmatprep.subr.mxu1 %v1188_v16  ;;  %p1156_p1 = scmp.ne.s32.totalorder %s834_s8, %s1155_s9  ;;  %p1161_p3 = scmp.lt.s32.totalorder %s1155_s9, %s1155_s9 }
 0x4e5   :  { %990 = vmatprep.subr.mxu0 %v1188_v16  ;;  %968 = vmatpush3.msra.mxu1 %v561_v22 }
 0x4e6   :  { %969 = vmatprep.subr.mxu1 %v1188_v16  ;;  %p1162_p4 = por %p1161_p3, %p1160_p2 }
 0x4e8   :  { %p1163_p5 = pnand %p1162_p4, %p1156_p1 }
 0x599   :  { %v295_v52 = vpop.f32.mrf.mxu0 }
 0x59b   :  { %v933_v53 = vpop.f32.mrf.mxu0 }
 0x59d   :  { %v365_v54 = vpop.f32.mrf.mxu0 }
 0x59e   :  { %v1287_v55 = vadd.f32 %v365_v54, %v295_v52 }
 0x59f   :  { %v940_v56 = vpop.f32.mrf.mxu0 }
 0x5a1   :  { %v435_v57 = vpop.f32.mrf.mxu0 }
 0x5a2   :  { %v446_v58 = vadd.f32 %v435_v57, %v200_v24  ;;  %v439_v63 = vadd.f32 %v435_v57, %v89_v62  ;;  %v560_v24 = vld [vmem:[#allocation7 + $0xc0] sm:$0xff] }
 0x5a3   :  { %v947_v59 = vpop.f32.mrf.mxu0  ;;  %970 = vmatpush3.msra.mxu1 %v560_v24 }
 0x5a4   :  { %448 = vrot.lane.b32.xlu1 %v446_v58, %s1192_s5  ;;  %v852_v0 = vmul.f32 -1.442695, %v439_v63  ;;  %971 = vmatprep.subr.mxu1 %v1188_v16  ;;  %v646_v58 = vld [vmem:[#allocation7 + $0x110] sm:$0xff]  ;;  %v645_v59 = vld [vmem:[#allocation7 + $0x108] sm:$0xff]  ;;  %v748_v63 = vld [vmem:[#allocation7 + $0x1e0] sm:$0xff] }
 0x5a5   :  { %972 = vmatpush3.msra.mxu1 %v559_v25 }
 0x5a6   :  { %1089 = vpow2.f32 %v852_v0  ;;  %973 = vmatprep.subr.mxu1 %v1188_v16  ;;  %v747_v0 = vld [vmem:[#allocation7 + $0x1d8] sm:$0xff] }
 0x5a7   :  { %974 = vmatpush3.msra.mxu1 %v558_v26 }
 0x5a8   :  { %975 = vmatprep.subr.mxu1 %v1188_v16 }
 0x5a9   :  { %976 = vmatpush3.msra.mxu1 %v557_v27 }
 0x5aa   :  { %977 = vmatprep.subr.mxu1 %v1188_v16 }
 0x5ab   :  { %978 = vmatpush3.msra.mxu1 %v556_v28 }
 0x5ac   :  { %979 = vmatprep.subr.mxu1 %v1188_v16 }
 0x5ad   :  { %980 = vmatpush3.msra.mxu1 %v555_v30 }
 0x5ae   :  { %981 = vmatprep.subr.mxu1 %v1188_v16 }
 0x5af   :  { %982 = vmatpush3.msra.mxu1 %v554_v31 }
 0x5b0   :  { %983 = vmatprep.subr.mxu1 %v1188_v16 }
 0x5b1   :  { %984 = vmatpush3.msra.mxu1 %v553_v32 }
 0x5b2   :  { %985 = vmatprep.subr.mxu1 %v1188_v16 }
 0x5b3   :  { %v1090_v1 = vpop.eup %1089  ;;  %986 = vmatpush3.msra.mxu1 %v552_v33 }
 0x5b4   :  { %v443_v4 = vadd.f32 1.0, %v1090_v1  ;;  %1025 = vmatprep.subr.mxu1 %v1188_v16  ;;  %v746_v1 = vld [vmem:[#allocation7 + $0x1d0] sm:$0xff] }
 0x5b6   :  { %1091 = vrcp.f32 %v443_v4  ;;  %v745_v4 = vld [vmem:[#allocation7 + $0x1c8] sm:$0xff] }
 0x5c3   :  { %v1092_v5 = vpop.eup %1091 }
 0x5c4   :  { %v458_v17 = vsub.f32 1.0, %v1092_v5  ;;  %v464_v20 = vmul.f32 %v1092_v5, %v1268_v48  ;;  %v1330_v48 = vshrl.u32 %v545_v47, 7 }
 0x5c6   :  { %v547_v49 = vsub.s32 0, %v1330_v48  ;;  %v570_v11 = vsub.s32 1, %v1330_v48  ;;  %v662_v19 = vsub.s32 2, %v1330_v48  ;;  %v754_v25 = vsub.s32 3, %v1330_v48 }
 0x5c8   :  { %v548_v51 = vrot.slane %v1336_v50, %v547_v49  ;;  %v755_v26 = vrot.slane %v1336_v50, %v754_v25 }
 0x616   :  { %v449_v6 = vpop.permute.xlu1 %448 }
 0x617   :  { %v451_v7 = vmul.f32 %v1092_v5, %v449_v6  ;;  %v744_v5 = vld [vmem:[#allocation7 + $0x1c0] sm:$0xff]  ;;  %v743_v6 = vld [vmem:[#allocation7 + $0x1b8] sm:$0xff] }
 0x619   :  { %453 = vrot.lane.b32.xlu1 %v451_v7, %s1187_s0  ;;  %v742_v7 = vld [vmem:[#allocation7 + $0x1b0] sm:$0xff] }
 0x68b   :  { %v454_v8 = vpop.permute.xlu1 %453 }
 0x68c   :  { %v456_v9 = vadd.f32 %v454_v8, %v89_v62  ;;  %v750_v62 = vld [vmem:[#allocation7 + $0x1f0] sm:$0xff]  ;;  %v741_v8 = vld [vmem:[#allocation7 + $0x1a8] sm:$0xff] }
 0x68e   :  { %1093 = vtanh.f32 %v456_v9  ;;  %v740_v9 = vld [vmem:[#allocation7 + $0x1a0] sm:$0xff] }
 0x69b   :  { %v1094_v2 = vpop.eup %1093 }
 0x69c   :  { %460 = vrot.lane.b32.xlu0 %v1094_v2, %s1190_s2  ;;  %v571_v2 = vrot.slane %v1336_v50, %v570_v11 }
 0x70e   :  { %v461_v18 = vpop.permute.xlu0 %460 }
 0x70f   :  { %v463_v21 = vmul.f32 %v461_v18, %v458_v17  ;;  %v737_v17 = vld [vmem:[#allocation7 + $0x188] sm:$0xff]  ;;  %v736_v18 = vld [vmem:[#allocation7 + $0x180] sm:$0xff] }
 0x711   :  { %v465_v23 = vadd.f32 %v464_v20, %v463_v21  ;;  %v663_v20 = vrot.slane %v1336_v50, %v662_v19 }
 0x713   :  { %469 = vrot.lane.b32.xlu1 %v465_v23, %s1190_s2 }
 0x785   :  { %v470_v29 = vpop.permute.xlu1 %469 }
 0x786   :  { %953 = vmatmul.mubr.msk.f32.vlgmr.msra.gmra.mxu0 %vm118_vm1, %v470_v29 }
 0x787   :  { %1022 = vmatprep.mubr.msk.f32.mxu0 %vm1189_vm0, %v1188_v16  ;;  %991 = vmatpush3.msra.mxu0 %v659_v34 }
 0x788   :  { %992 = vmatprep.subr.mxu0 %v1188_v16 }
 0x789   :  { %993 = vmatpush3.msra.mxu0 %v658_v35 }
 0x78a   :  { %994 = vmatprep.subr.mxu0 %v1188_v16 }
 0x78b   :  { %995 = vmatpush3.msra.mxu0 %v657_v36 }
 0x78c   :  { %996 = vmatprep.subr.mxu0 %v1188_v16 }
 0x78d   :  { %997 = vmatpush3.msra.mxu0 %v656_v37 }
 0x78e   :  { %998 = vmatprep.subr.mxu0 %v1188_v16 }
 0x78f   :  { %999 = vmatpush3.msra.mxu0 %v655_v38 }
 0x790   :  { %1000 = vmatprep.subr.mxu0 %v1188_v16 }
 0x791   :  { %1001 = vmatpush3.msra.mxu0 %v654_v39 }
 0x792   :  { %1002 = vmatprep.subr.mxu0 %v1188_v16 }
 0x793   :  { %1003 = vmatpush3.msra.mxu0 %v653_v40 }
 0x794   :  { %1004 = vmatprep.subr.mxu0 %v1188_v16 }
 0x795   :  { %1005 = vmatpush3.msra.mxu0 %v652_v41 }
 0x796   :  { %1006 = vmatprep.subr.mxu0 %v1188_v16 }
 0x797   :  { %1007 = vmatpush3.msra.mxu0 %v651_v42 }
 0x798   :  { %1008 = vmatprep.subr.mxu0 %v1188_v16 }
 0x799   :  { %1009 = vmatpush3.msra.mxu0 %v650_v43 }
 0x79a   :  { %1010 = vmatprep.subr.mxu0 %v1188_v16 }
 0x79b   :  { %1011 = vmatpush3.msra.mxu0 %v649_v44 }
 0x79c   :  { %1012 = vmatprep.subr.mxu0 %v1188_v16 }
 0x79d   :  { %1013 = vmatpush3.msra.mxu0 %v648_v45 }
 0x79e   :  { %1014 = vmatprep.subr.mxu0 %v1188_v16 }
 0x79f   :  { %1015 = vmatpush3.msra.mxu0 %v647_v46 }
 0x7a0   :  { %1016 = vmatprep.subr.mxu0 %v1188_v16 }
 0x7a1   :  { %1017 = vmatpush3.msra.mxu0 %v646_v58 }
 0x7a2   :  { %1018 = vmatprep.subr.mxu0 %v1188_v16 }
 0x7a3   :  { %1019 = vmatpush3.msra.mxu0 %v645_v59 }
 0x7a4   :  { %1020 = vmatprep.subr.mxu0 %v1188_v16 }
 0x7a5   :  { %1021 = vmatpush3.msra.mxu0 %v644_v60 }
 0x846   :  { %v539_v52 = vpop.f32.mrf.mxu0 }
 0x847   :  { %v543_v53 = vadd.f32 %v539_v52, %v1287_v55  ;;  %v749_v55 = vld [vmem:[#allocation7 + $0x1e8] sm:$0xff] }
 0x848   :  { %v954_v54 = vpop.f32.mrf.mxu0 }
 0x849   :  { %v549_v56 = vadd.f32 %v548_v51, %v543_v53 }
 0x84b   :  { %v550_v57 = vmax.f32 %v549_v56, 0.0 }
 0x84d   :  { %988 = vmatmul.mubr.f32.vlgmr.msra.gmra.mxu1 %v550_v57 }
 0x84e   :  { %1057 = vmatprep.mubr.msk.f32.mxu1 %vm1189_vm0, %v1188_v16  ;;  %1026 = vmatpush3.msra.mxu1 %v751_v61 }
 0x84f   :  { %1027 = vmatprep.subr.mxu1 %v1188_v16 }
 0x850   :  { %1028 = vmatpush3.msra.mxu1 %v750_v62 }
 0x851   :  { %1029 = vmatprep.subr.mxu1 %v1188_v16 }
 0x852   :  { %1030 = vmatpush3.msra.mxu1 %v749_v55 }
 0x853   :  { %1031 = vmatprep.subr.mxu1 %v1188_v16 }
 0x854   :  { %1032 = vmatpush3.msra.mxu1 %v748_v63 }
 0x855   :  { %1033 = vmatprep.subr.mxu1 %v1188_v16 }
 0x856   :  { %1034 = vmatpush3.msra.mxu1 %v747_v0 }
 0x857   :  { %1035 = vmatprep.subr.mxu1 %v1188_v16 }
 0x858   :  { %1036 = vmatpush3.msra.mxu1 %v746_v1 }
 0x859   :  { %1037 = vmatprep.subr.mxu1 %v1188_v16 }
 0x85a   :  { %1038 = vmatpush3.msra.mxu1 %v745_v4 }
 0x85b   :  { %1039 = vmatprep.subr.mxu1 %v1188_v16 }
 0x85c   :  { %1040 = vmatpush3.msra.mxu1 %v744_v5 }
 0x85d   :  { %1041 = vmatprep.subr.mxu1 %v1188_v16 }
 0x85e   :  { %1042 = vmatpush3.msra.mxu1 %v743_v6 }
 0x85f   :  { %1043 = vmatprep.subr.mxu1 %v1188_v16 }
 0x860   :  { %1044 = vmatpush3.msra.mxu1 %v742_v7 }
 0x861   :  { %1045 = vmatprep.subr.mxu1 %v1188_v16 }
 0x862   :  { %1046 = vmatpush3.msra.mxu1 %v741_v8 }
 0x863   :  { %1047 = vmatprep.subr.mxu1 %v1188_v16 }
 0x864   :  { %1048 = vmatpush3.msra.mxu1 %v740_v9 }
 0x865   :  { %1049 = vmatprep.subr.mxu1 %v1188_v16 }
 0x866   :  { %1050 = vmatpush3.msra.mxu1 %v739_v10 }
 0x867   :  { %1051 = vmatprep.subr.mxu1 %v1188_v16 }
 0x868   :  { %1052 = vmatpush3.msra.mxu1 %v738_v15 }
 0x869   :  { %1053 = vmatprep.subr.mxu1 %v1188_v16 }
 0x86a   :  { %1054 = vmatpush3.msra.mxu1 %v737_v17 }
 0x86b   :  { %1055 = vmatprep.subr.mxu1 %v1188_v16 }
 0x86c   :  { %1056 = vmatpush3.msra.mxu1 %v736_v18 }
 0x90d   :  { %v638_v3 = vpop.f32.mrf.mxu1 }
 0x90e   :  { %v639_v12 = vadd.f32 %v638_v3, %v571_v2 }
 0x90f   :  { %v989_v13 = vpop.f32.mrf.mxu1 }
 0x910   :  { %v642_v14 = vmax.f32 %v639_v12, 0.0 }
 0x912   :  { %1023 = vmatmul.mubr.f32.vlgmr.msra.gmra.mxu0 %v642_v14 }
 0x9d2   :  { %v730_v21 = vpop.f32.mrf.mxu0 }
 0x9d3   :  { %v731_v22 = vadd.f32 %v730_v21, %v663_v20 }
 0x9d4   :  { %v1024_v23 = vpop.f32.mrf.mxu0 }
 0x9d5   :  { %v734_v24 = vmax.f32 %v731_v22, 0.0 }
 0x9d7   :  { %1058 = vmatmul.mubr.f32.vlgmr.msra.gmra.mxu1 %v734_v24 }
 0xa97   :  { %v822_v27 = vpop.f32.mrf.mxu1 }
 0xa98   :  { %v823_v28 = vadd.f32 %v822_v27, %v755_v26 }
 0xa99   :  { %v1059_v16 = vpop.f32.mrf.mxu1 }
 0xa9a   :  { %826 = vst [vmem:[#allocation8] sm:$0x3] %v823_v28 }
 0xa9b   :  { %1166 = shalt.err (!%p1163_p5)
}
 0xa9c   :  { %836 = dma.vmem_to_hbm [thread:$0]  %s834_s8, 32, %s1372_s4, [#allocation4]  }
 0xa9d   :  { %1179 = dma.done.wait [#allocation4], 32  }
 0xa9e   :  { %1180 = vsyncadd [#allocation4], 4294967264 }
 0xa9f   :  { %840 = vsyncpa [#allocation3], 1 }
 0xaa0   :  { %841 = vsyncpa [#allocation6], 1 }
 0xaa1   :  { %842 = vsyncpa [#allocation4], 1 }

</bundles_post_ra>
